<compile_context>
chip_gen: v5e
topology: v5e:2x2
jax: 0.10.0
libtpu: 0.0.40
codegen_flags: <defaults>
</compile_context>

<pallas_src>
import functools

import jax
import jax.numpy as jnp
from jax.experimental import pallas as pl
from jax.experimental.pallas import tpu as pltpu


# ----------------------------------------------------------------------------- helpers
def _round_up(x, m):
    return ((x + m - 1) // m) * m


# ----------------------------------------------------------------------------- fused LayerNorm + matmul (+ bias)
def _ln_dense_kernel(x_ref, wln_ref, bln_ref, w_ref, b_ref, o_ref, *, eps):
    # x block covers the full feature (K) dim, so LN statistics are exact.
    x = x_ref[...].astype(jnp.float32)                       # (tm, K)
    mean = jnp.mean(x, axis=-1, keepdims=True)
    xc = x - mean
    var = jnp.mean(xc * xc, axis=-1, keepdims=True)
    inv = jax.lax.rsqrt(var + eps)
    xn = xc * inv * wln_ref[...] + bln_ref[...]               # f32, (tm, K)
    acc = jnp.dot(xn.astype(w_ref.dtype), w_ref[...],
                  preferred_element_type=jnp.float32)         # MXU
    o_ref[...] = (acc + b_ref[...]).astype(o_ref.dtype)


def ln_dense(x2d, wln, bln, w, b=None, *, eps=1e-5, tm_cap=256, tn_cap=256):
    """out = LayerNorm(x2d) @ w + b   (LN over the full, untiled feature dim)."""
    M, K = x2d.shape
    K2, Nf = w.shape
    assert K == K2
    dtype = x2d.dtype

    tm = min(tm_cap, _round_up(M, 8))
    tn = min(tn_cap, _round_up(Nf, 128))
    Mp, Np_ = _round_up(M, tm), _round_up(Nf, tn)

    xp = x2d if Mp == M else jnp.zeros((Mp, K), dtype).at[:M].set(x2d)
    wp = w if Np_ == Nf else jnp.zeros((K, Np_), w.dtype).at[:, :Nf].set(w)
    if b is None:
        b = jnp.zeros((Nf,), jnp.float32)
    bp = jnp.zeros((1, Np_), jnp.float32).at[0, :Nf].set(b.astype(jnp.float32))
    wln2 = wln.reshape(1, K).astype(jnp.float32)
    bln2 = bln.reshape(1, K).astype(jnp.float32)

    itemsize = jnp.dtype(dtype).itemsize
    out = pl.pallas_call(
        functools.partial(_ln_dense_kernel, eps=eps),
        out_shape=jax.ShapeDtypeStruct((Mp, Np_), dtype),
        grid_spec=pltpu.PrefetchScalarGridSpec(
            num_scalar_prefetch=0,
            grid=(Mp // tm, Np_ // tn),
            in_specs=[
                pl.BlockSpec((tm, K), lambda i, j: (i, 0)),
                pl.BlockSpec((1, K), lambda i, j: (0, 0)),
                pl.BlockSpec((1, K), lambda i, j: (0, 0)),
                pl.BlockSpec((K, tn), lambda i, j: (0, j)),
                pl.BlockSpec((1, tn), lambda i, j: (0, j)),
            ],
            out_specs=pl.BlockSpec((tm, tn), lambda i, j: (i, j)),
        ),
        compiler_params=pltpu.CompilerParams(
            dimension_semantics=("parallel", "parallel")),
        cost_estimate=pl.CostEstimate(
            flops=2 * M * K * Nf + 8 * M * K,
            transcendentals=0,
            bytes_accessed=(M * K + K * Nf + M * Nf) * itemsize),
    )(xp, wln2, bln2, wp, bp)
    return out[:M, :Nf]


# ----------------------------------------------------------------------------- matmul + bias + LayerScale + residual
def _dense_ls_res_kernel(x_ref, w_ref, b_ref, g_ref, r_ref, o_ref, acc_ref):
    @pl.when(pl.program_id(2) == 0)
    def _():
        acc_ref[...] = jnp.zeros_like(acc_ref)

    acc_ref[...] += jnp.dot(x_ref[...], w_ref[...],
                            preferred_element_type=jnp.float32)

    @pl.when(pl.program_id(2) == pl.num_programs(2) - 1)
    def _():
        y = acc_ref[...] + b_ref[...]                         # f32
        o_ref[...] = (r_ref[...].astype(jnp.float32)
                      + y * g_ref[...]).astype(o_ref.dtype)


def dense_ls_res(x2d, w, b, gamma, residual2d, *,
                 tm_cap=256, tn_cap=256, tk_cap=512):
    """out = residual + (x2d @ w + b) * gamma   (gamma broadcast over last dim)."""
    M, K = x2d.shape
    K2, Nf = w.shape
    assert K == K2
    dtype = residual2d.dtype

    tm = min(tm_cap, _round_up(M, 8))
    tk = min(tk_cap, _round_up(K, 128))
    tn = min(tn_cap, _round_up(Nf, 128))
    Mp, Kp, Np_ = _round_up(M, tm), _round_up(K, tk), _round_up(Nf, tn)

    xp = x2d if (Mp, Kp) == (M, K) else (
        jnp.zeros((Mp, Kp), x2d.dtype).at[:M, :K].set(x2d))
    wp = w if (Kp, Np_) == (K, Nf) else (
        jnp.zeros((Kp, Np_), w.dtype).at[:K, :Nf].set(w))
    rp = residual2d if (Mp, Np_) == (M, Nf) else (
        jnp.zeros((Mp, Np_), dtype).at[:M, :Nf].set(residual2d))
    if b is None:
        b = jnp.zeros((Nf,), jnp.float32)
    bp = jnp.zeros((1, Np_), jnp.float32).at[0, :Nf].set(b.astype(jnp.float32))
    gp = jnp.zeros((1, Np_), jnp.float32).at[0, :Nf].set(gamma.astype(jnp.float32))

    itemsize = jnp.dtype(dtype).itemsize
    out = pl.pallas_call(
        _dense_ls_res_kernel,
        out_shape=jax.ShapeDtypeStruct((Mp, Np_), dtype),
        grid_spec=pltpu.PrefetchScalarGridSpec(
            num_scalar_prefetch=0,
            grid=(Mp // tm, Np_ // tn, Kp // tk),
            in_specs=[
                pl.BlockSpec((tm, tk), lambda i, j, k: (i, k)),
                pl.BlockSpec((tk, tn), lambda i, j, k: (k, j)),
                pl.BlockSpec((1, tn), lambda i, j, k: (0, j)),
                pl.BlockSpec((1, tn), lambda i, j, k: (0, j)),
                pl.BlockSpec((tm, tn), lambda i, j, k: (i, j)),
            ],
            out_specs=pl.BlockSpec((tm, tn), lambda i, j, k: (i, j)),
            scratch_shapes=[pltpu.VMEM((tm, tn), jnp.float32)],
        ),
        compiler_params=pltpu.CompilerParams(
            dimension_semantics=("parallel", "parallel", "arbitrary")),
        cost_estimate=pl.CostEstimate(
            flops=2 * M * K * Nf + 2 * M * Nf,
            transcendentals=0,
            bytes_accessed=(M * K + K * Nf + 2 * M * Nf) * itemsize),
    )(xp, wp, bp, gp, rp)
    return out[:M, :Nf]


# ----------------------------------------------------------------------------- attention core
def _attention_kernel(q_ref, k_ref, v_ref, o_ref, *, scale, n_valid):
    q = q_ref[...].astype(jnp.float32)                        # (bh, Np, hd)
    k = k_ref[...].astype(jnp.float32)
    s = jnp.einsum("bqd,bkd->bqk", q, k,
                   preferred_element_type=jnp.float32) * scale
    if n_valid < s.shape[-1]:
        col = jax.lax.broadcasted_iota(jnp.int32, s.shape, 2)
        s = jnp.where(col < n_valid, s, -1e30)
    m = jnp.max(s, axis=-1, keepdims=True)
    p = jnp.exp(s - m)
    p = p / jnp.sum(p, axis=-1, keepdims=True)
    o = jnp.einsum("bqk,bkd->bqd", p.astype(v_ref.dtype), v_ref[...],
                   preferred_element_type=jnp.float32)
    o_ref[...] = o.astype(o_ref.dtype)


def attention_core(q, k, v, *, scale):
    """q, k, v: (B*H, N, hd) -> softmax(q k^T * scale) v per (batch, head)."""
    # TODO(synk): switch to a flash-style tiled kernel for long sequences; full
    # (N, N) scores per head are fine at these sizes.
    BH, N, hd = q.shape
    Np = _round_up(N, 8)
    itemsize = jnp.dtype(q.dtype).itemsize
    # Size the per-step head batch to ~2 MiB of live VMEM (inputs + scores + out).
    per_head = 4 * Np * hd * itemsize + Np * Np * 4 + 2 * Np * hd * 4
    bh_tile = max(1, min(BH, (2 * 1024 * 1024) // per_head))
    BHp = _round_up(BH, bh_tile)

    def pad(t):
        if (BHp, Np) == (BH, N):
            return t
        return jnp.zeros((BHp, Np, hd), t.dtype).at[:BH, :N].set(t)

    qp, kp, vp = pad(q), pad(k), pad(v)

    out = pl.pallas_call(
        functools.partial(_attention_kernel, scale=scale, n_valid=N),
        out_shape=jax.ShapeDtypeStruct((BHp, Np, hd), q.dtype),
        grid_spec=pltpu.PrefetchScalarGridSpec(
            num_scalar_prefetch=0,
            grid=(BHp // bh_tile,),
            in_specs=[
                pl.BlockSpec((bh_tile, Np, hd), lambda i: (i, 0, 0)),
                pl.BlockSpec((bh_tile, Np, hd), lambda i: (i, 0, 0)),
                pl.BlockSpec((bh_tile, Np, hd), lambda i: (i, 0, 0)),
            ],
            out_specs=pl.BlockSpec((bh_tile, Np, hd), lambda i: (i, 0, 0)),
        ),
        compiler_params=pltpu.CompilerParams(dimension_semantics=("parallel",)),
    )(qp, kp, vp)
    return out[:BH, :N, :]


# ----------------------------------------------------------------------------- full block forward
def transformer_block(x, params):
    B, N, C = x.shape
    H = params["num_heads"]
    hd = C // H
    rows = B * N
    x2 = x.reshape(rows, C)

    # --- attention branch: x + ls1 * proj(attn(norm1(x))) ---
    qkv = ln_dense(x2, params["ln1_w"], params["ln1_b"], params["w_qkv"], None)
    qkv = qkv.reshape(B, N, 3, H, hd).transpose(2, 0, 3, 1, 4)      # (3,B,H,N,hd)
    q = qkv[0].reshape(B * H, N, hd)
    k = qkv[1].reshape(B * H, N, hd)
    v = qkv[2].reshape(B * H, N, hd)
    o = attention_core(q, k, v, scale=hd ** -0.5)                    # (B*H,N,hd)
    o = o.reshape(B, H, N, hd).transpose(0, 2, 1, 3).reshape(rows, C)
    x2 = dense_ls_res(o, params["w_proj"], params["b_proj"],
                      params["ls1_gamma"], x2)

    # --- MLP branch: x + ls2 * fc2(gelu(fc1(norm2(x)))) ---
    h = ln_dense(x2, params["ln2_w"], params["ln2_b"],
                 params["w_fc1"], params["b_fc1"])
    # Exact (erf) GELU to match torch.nn.GELU default; kept as an XLA op between
    # the fc1 and fc2 kernels.
    # TODO(synk): fuse GELU into the fc2 kernel prologue once erf lowering is
    # guaranteed inside Mosaic on all TPU generations.
    h = jax.nn.gelu(h, approximate=False)
    x2 = dense_ls_res(h, params["w_fc2"], params["b_fc2"],
                      params["ls2_gamma"], x2)
    return x2.reshape(B, N, C)


# ----------------------------------------------------------------------------- reference (plain JAX)
def transformer_block_reference(x, params):
    hi = jax.lax.Precision.HIGHEST

    def ln(t, w, b, eps=1e-5):
        mu = jnp.mean(t, -1, keepdims=True)
        var = jnp.mean((t - mu) ** 2, -1, keepdims=True)
        return (t - mu) * jax.lax.rsqrt(var + eps) * w + b

    B, N, C = x.shape
    H = params["num_heads"]
    hd = C // H

    h = ln(x, params["ln1_w"], params["ln1_b"])
    qkv = jnp.einsum("bnc,cd->bnd", h, params["w_qkv"], precision=hi)
    qkv = qkv.reshape(B, N, 3, H, hd).transpose(2, 0, 3, 1, 4)
    q, k, v = qkv[0], qkv[1], qkv[2]
    attn = jnp.einsum("bhqd,bhkd->bhqk", q, k, precision=hi) * (hd ** -0.5)
    attn = jax.nn.softmax(attn, axis=-1)
    o = jnp.einsum("bhqk,bhkd->bhqd", attn, v, precision=hi)
    o = o.transpose(0, 2, 1, 3).reshape(B, N, C)
    o = jnp.einsum("bnc,cd->bnd", o, params["w_proj"], precision=hi) + params["b_proj"]
    x = x + o * params["ls1_gamma"]

    h = ln(x, params["ln2_w"], params["ln2_b"])
    h = jnp.einsum("bnc,ch->bnh", h, params["w_fc1"], precision=hi) + params["b_fc1"]
    h = jax.nn.gelu(h, approximate=False)
    h = jnp.einsum("bnh,hc->bnc", h, params["w_fc2"], precision=hi) + params["b_fc2"]
    x = x + h * params["ls2_gamma"]
    return x


# ----------------------------------------------------------------------------- demo / check
if __name__ == "__main__":
    # block(dim=4, num_heads=8): out_channel C = 32, mlp hidden = 128
    B, N, head_dim, H = 2, 8, 4, 8
    C = head_dim * H
    HID = int(C * 4.0)
    init_values = 1e-5

    key = jax.random.PRNGKey(0)
    ks = jax.random.split(key, 8)
    w_init = lambda k, shape: 0.02 * jax.random.normal(k, shape, dtype=jnp.float32)

    params = {
        "num_heads": H,
        "ln1_w": jnp.ones((C,), jnp.float32), "ln1_b": jnp.zeros((C,), jnp.float32),
        "w_qkv": w_init(ks[0], (C, 3 * C)),                       # qkv_bias=False
        "w_proj": w_init(ks[1], (C, C)), "b_proj": w_init(ks[2], (C,)),
        "ls1_gamma": init_values * jnp.ones((C,), jnp.float32),
        "ln2_w": jnp.ones((C,), jnp.float32), "ln2_b": jnp.zeros((C,), jnp.float32),
        "w_fc1": w_init(ks[3], (C, HID)), "b_fc1": w_init(ks[4], (HID,)),
        "w_fc2": w_init(ks[5], (HID, C)), "b_fc2": w_init(ks[6], (C,)),
        "ls2_gamma": init_values * jnp.ones((C,), jnp.float32),
    }
    x = jax.random.normal(ks[7], (B, N, C), dtype=jnp.float32)

    out = transformer_block(x, params)
    out = jax.block_until_ready(out)

    ref = transformer_block_reference(x, params)
    assert out.shape == x.shape and out.dtype == x.dtype
    assert jnp.allclose(out, ref, atol=1e-5, rtol=1e-5), float(jnp.max(jnp.abs(out - ref)))

    print("KERNEL_OK")
</pallas_src>

<mosaic_0001>
module attributes {stable_mosaic.version = 11 : i64} {
  func.func @_ln_dense_kernel(%arg0: i32, %arg1: i32, %arg2: memref<16x32xf32, #tpu.memory_space<vmem>>, %arg3: memref<1x32xf32, #tpu.memory_space<vmem>>, %arg4: memref<1x32xf32, #tpu.memory_space<vmem>>, %arg5: memref<32x128xf32, #tpu.memory_space<vmem>>, %arg6: memref<1x128xf32, #tpu.memory_space<vmem>>, %arg7: memref<16x128xf32, #tpu.memory_space<vmem>>) attributes {dimension_semantics = [#tpu.dimension_semantics<parallel>, #tpu.dimension_semantics<parallel>], iteration_bounds = array<i64: 1, 1>, scalar_prefetch = 0 : i64, scratch_operands = 0 : i64, tpu.core_type = #tpu.core_type<tc>, window_params = [{transform_indices = @transform_0, window_bounds = array<i64: 16, 32>}, {pipeline_mode = #tpu.pipeline_mode<synchronous>, transform_indices = @transform_1, window_bounds = array<i64: 1, 32>}, {pipeline_mode = #tpu.pipeline_mode<synchronous>, transform_indices = @transform_2, window_bounds = array<i64: 1, 32>}, {transform_indices = @transform_3, window_bounds = array<i64: 32, 128>}, {transform_indices = @transform_4, window_bounds = array<i64: 1, 128>}, {transform_indices = @transform_5, window_bounds = array<i64: 16, 128>}]} {
    %c0 = arith.constant 0 : index
    %c0_0 = arith.constant 0 : index
    %0 = vector.load %arg2[%c0, %c0_0] : memref<16x32xf32, #tpu.memory_space<vmem>>, vector<16x32xf32>
    %cst = arith.constant dense<0.000000e+00> : vector<16xf32>
    %1 = vector.multi_reduction <add>, %0, %cst [1] : vector<16x32xf32> to vector<16xf32>
    %2 = vector.shape_cast %1 : vector<16xf32> to vector<16x1xf32>
    %cst_1 = arith.constant 3.200000e+01 : f32
    %3 = vector.broadcast %cst_1 : f32 to vector<16x1xf32>
    %4 = arith.divf %2, %3 : vector<16x1xf32>
    %5 = vector.broadcast %4 : vector<16x1xf32> to vector<16x32xf32>
    %6 = arith.subf %0, %5 : vector<16x32xf32>
    %7 = arith.mulf %6, %6 : vector<16x32xf32>
    %cst_2 = arith.constant dense<0.000000e+00> : vector<16xf32>
    %8 = vector.multi_reduction <add>, %7, %cst_2 [1] : vector<16x32xf32> to vector<16xf32>
    %9 = vector.shape_cast %8 : vector<16xf32> to vector<16x1xf32>
    %cst_3 = arith.constant 3.200000e+01 : f32
    %10 = vector.broadcast %cst_3 : f32 to vector<16x1xf32>
    %11 = arith.divf %9, %10 : vector<16x1xf32>
    %cst_4 = arith.constant 9.99999974E-6 : f32
    %12 = vector.broadcast %cst_4 : f32 to vector<16x1xf32>
    %13 = arith.addf %11, %12 : vector<16x1xf32>
    %14 = math.rsqrt %13 : vector<16x1xf32>
    %15 = vector.broadcast %14 : vector<16x1xf32> to vector<16x32xf32>
    %16 = arith.mulf %6, %15 : vector<16x32xf32>
    %c0_5 = arith.constant 0 : index
    %c0_6 = arith.constant 0 : index
    %17 = vector.load %arg3[%c0_5, %c0_6] : memref<1x32xf32, #tpu.memory_space<vmem>>, vector<1x32xf32>
    %18 = vector.broadcast %17 : vector<1x32xf32> to vector<16x32xf32>
    %19 = arith.mulf %16, %18 : vector<16x32xf32>
    %c0_7 = arith.constant 0 : index
    %c0_8 = arith.constant 0 : index
    %20 = vector.load %arg4[%c0_7, %c0_8] : memref<1x32xf32, #tpu.memory_space<vmem>>, vector<1x32xf32>
    %21 = vector.broadcast %20 : vector<1x32xf32> to vector<16x32xf32>
    %22 = arith.addf %19, %21 : vector<16x32xf32>
    %c0_9 = arith.constant 0 : index
    %c0_10 = arith.constant 0 : index
    %23 = vector.load %arg5[%c0_9, %c0_10] : memref<32x128xf32, #tpu.memory_space<vmem>>, vector<32x128xf32>
    %cst_11 = arith.constant dense<0.000000e+00> : vector<16x128xf32>
    %24 = tpu.matmul %22, %23, %cst_11 {dimension_numbers = #tpu.dot_dimension_numbers<[1], [0], [0], [1], [0, 0, 1, 1], [], []>} : vector<16x32xf32>, vector<32x128xf32>, vector<16x128xf32> -> vector<16x128xf32>
    %c0_12 = arith.constant 0 : index
    %c0_13 = arith.constant 0 : index
    %25 = vector.load %arg6[%c0_12, %c0_13] : memref<1x128xf32, #tpu.memory_space<vmem>>, vector<1x128xf32>
    %26 = vector.broadcast %25 : vector<1x128xf32> to vector<16x128xf32>
    %27 = arith.addf %24, %26 : vector<16x128xf32>
    %c0_14 = arith.constant 0 : index
    %c0_15 = arith.constant 0 : index
    %28 = vector.load %arg7[%c0_14, %c0_15] : memref<16x128xf32, #tpu.memory_space<vmem>>, vector<16x128xf32>
    tpu.vector_store %arg7[%c0_14, %c0_15], %27 {strides = array<i32>} : memref<16x128xf32, #tpu.memory_space<vmem>>, vector<16x128xf32>,
    return
  }
  func.func @transform_0(%arg0: i32, %arg1: i32) -> (i32, i32) {
    %c0_i32 = arith.constant 0 : i32
    %c0_i32_0 = arith.constant 0 : i32
    return %arg0, %c0_i32 : i32, i32
  }
  func.func @transform_1(%arg0: i32, %arg1: i32) -> (i32, i32) {
    %c0_i32 = arith.constant 0 : i32
    %c0_i32_0 = arith.constant 0 : i32
    %c0_i32_1 = arith.constant 0 : i32
    return %c0_i32, %c0_i32_0 : i32, i32
  }
  func.func @transform_2(%arg0: i32, %arg1: i32) -> (i32, i32) {
    %c0_i32 = arith.constant 0 : i32
    %c0_i32_0 = arith.constant 0 : i32
    %c0_i32_1 = arith.constant 0 : i32
    return %c0_i32, %c0_i32_0 : i32, i32
  }
  func.func @transform_3(%arg0: i32, %arg1: i32) -> (i32, i32) {
    %c0_i32 = arith.constant 0 : i32
    %c0_i32_0 = arith.constant 0 : i32
    return %c0_i32, %arg1 : i32, i32
  }
  func.func @transform_4(%arg0: i32, %arg1: i32) -> (i32, i32) {
    %c0_i32 = arith.constant 0 : i32
    %c0_i32_0 = arith.constant 0 : i32
    return %c0_i32, %arg1 : i32, i32
  }
  func.func @transform_5(%arg0: i32, %arg1: i32) -> (i32, i32) {
    %c0_i32 = arith.constant 0 : i32
    return %arg0, %arg1 : i32, i32
  }
}

</mosaic_0001>

<bundles_post_ra>
// kernel: tpu_custom_call.1
= control target key start
LH: loop header
LB: loop body
LE: loop exit
PB: predicated region body
PF: predicated region fallthrough
CT: control target
= control target key end

     0   :  { %10 = vsyncpa [#allocation3], 0  ;;  %s385_s0 = inlined_call_operand.hbm [shape: f32[16,32], index: 0, kind: input, shape index: {}]   ;;  %s386_s1 = inlined_call_operand.hbm [shape: f32[1,32], index: 1, kind: input, shape index: {}]   ;;  %s387_s2 = inlined_call_operand.vmem [shape: f32[1,32], index: 2, kind: input, shape index: {}]   ;;  %s388_s3 = inlined_call_operand.hbm [shape: f32[32,128], index: 3, kind: input, shape index: {}]   ;;  %s389_s4 = inlined_call_operand.vmem [shape: f32[1,128], index: 4, kind: input, shape index: {}]   ;;  %s390_s5 = inlined_call_operand.hbm [shape: f32[16,128], index: 5, kind: output, shape index: {}]  }
   0x1   :  { %11 = vsyncpa [#allocation6], 0  ;;  %s31_s20 = sshll.u32 %s386_s1, 4  ;;  %s32_s20 = int_to_ptr.hbm [resolvable:$true] %s31_s20 }
   0x2   :  { %12 = vsyncpa [#allocation4], 0  ;;  %s315_s21 = smov [#allocation5]   ;;  %s17_s25 = sshll.u32 %s385_s0, 4  ;;  %s18_s25 = int_to_ptr.hbm [resolvable:$true] %s17_s25 }
   0x3   :  { %s33_s22 = sshll.u32 %s315_s21, 4  ;;  %s316_s26 = smov [#allocation2]   ;;  %s34_s22 = int_to_ptr.vmem [resolvable:$true] %s33_s22 }
   0x4   :  { %36 = dma.hbm_to_vmem [thread:$0]  %s32_s20, 16, %s34_s22, [#allocation6]  }
   0x5   :  { %s19_s27 = sshll.u32 %s316_s26, 4  ;;  %s317_s28 = smov 128   ;;  %s20_s27 = int_to_ptr.vmem [resolvable:$true] %s19_s27 }
   0x6   :  { %s318_s29 = smov 8   ;;  %s43_s6 = sshll.u32 %s388_s3, 4  ;;  %s44_s6 = int_to_ptr.hbm [resolvable:$true] %s43_s6 }
   0x7   :  { %25 = dma.hbm_to_vmem [thread:$0]  %s18_s25, 256, %s20_s27, [#allocation3], %s317_s28, %s317_s28, %s318_s29  }
   0x8   :  { %s319_s7 = smov [#allocation7]  }
   0x9   :  { %s45_s8 = sshll.u32 %s319_s7, 4  ;;  %s46_s8 = int_to_ptr.vmem [resolvable:$true] %s45_s8 }
   0xa   :  { %51 = dma.hbm_to_vmem [thread:$0]  %s44_s6, 512, %s46_s8, [#allocation6], %s317_s28, %s317_s28, %s318_s29  }
   0xb   :  { %309 = dma.done.wait [#allocation3], 256  }
   0xc   :  { %310 = vsyncadd [#allocation3], 4294967040 }
   0xd   :  { %311 = dma.done.wait [#allocation6], 528  }
   0xe   :  { %312 = vsyncadd [#allocation6], 4294966768  ;;  %vm68_vm0 = vcmask 261120   ;;  %v66_v0 = vld [vmem:[#allocation2] sm:$0xff]  ;;  %v67_v2 = vld [vmem:[#allocation2 + $0x8] sm:$0xff]  ;;  %v320_v4 = vmov 32.0  }
   0xf   :  { %v69_v1 = vsel %vm68_vm0, %v66_v0, 0.0  ;;  %v72_v3 = vsel %vm68_vm0, %v67_v2, 0.0  ;;  %207 = vrcp.f32 %v320_v4  ;;  %v135_v21 = vld [vmem:[#allocation7 + $0x18] sm:$0xff]  ;;  %v134_v22 = vld [vmem:[#allocation7 + $0x10] sm:$0xff]  ;;  %v133_v23 = vld [vmem:[#allocation7 + $0x8] sm:$0xff]  ;;  %s177_s14 = sshll.u32 %s390_s5, 4  ;;  %s178_s14 = int_to_ptr.hbm [resolvable:$true] %s177_s14 }
  0x10   :  { %70 = vadd.xlane.f32.xlu0 %v69_v1  ;;  %158 = vmatpush.msra.mxu0 %v135_v21  ;;  %v132_v24 = vld [vmem:[#allocation7] sm:$0xff]  ;;  %v204_v39 = vld [vmem:[#allocation5] ss:$0 sm:$0xff]  ;;  %v205_v43 = vld [vmem:[%s387_s2] ss:$0 sm:$0xff]  ;;  %s321_s2 = smov [#allocation8]  }
  0x11   :  { %193 = vmatpush.msra.mxu1 %v135_v21  ;;  %v206_v53 = vld [vmem:[%s389_s4] ss:$0 sm:$0xff]  ;;  %s175_s11 = sshll.u32 %s321_s2, 4  ;;  %s176_s11 = int_to_ptr.vmem [resolvable:$true] %s175_s11 }
  0x12   :  { %159 = vmatpush.msra.mxu0 %v134_v22 }
  0x13   :  { %194 = vmatpush.msra.mxu1 %v134_v22 }
  0x14   :  { %160 = vmatpush.msra.mxu0 %v133_v23 }
  0x15   :  { %v208_v5 = vpop.eup %207  ;;  %195 = vmatpush.msra.mxu1 %v133_v23 }
  0x16   :  { %v76_v6 = vmul.f32 32.0, %v208_v5  ;;  %vm80_vm1 = vweird.f32 %v208_v5  ;;  %161 = vmatpush.msra.mxu0 %v132_v24 }
  0x17   :  { %196 = vmatpush.msra.mxu1 %v132_v24 }
  0x18   :  { %73 = vadd.xlane.f32.xlu0 %v72_v3  ;;  %v77_v7 = vsub.f32 1.0, %v76_v6 }
  0x1a   :  { %v78_v8 = vmul.f32 %v208_v5, %v77_v7 }
  0x1c   :  { %v79_v9 = vadd.f32 %v208_v5, %v78_v8 }
  0x1e   :  { %v81_v10 = vsel %vm80_vm1, %v208_v5, %v79_v9 }
  0x83   :  { %v71_v11 = vpop.xlane.xlu0 %70 }
  0x84   :  { %v82_v12 = vmul.f32 %v81_v10, %v71_v11 }
  0x86   :  { %v84_v13 = vsub.f32 %v66_v0, %v82_v12 }
  0x88   :  { %v86_v14 = vmul.f32 %v84_v13, %v84_v13 }
  0x8a   :  { %v88_v15 = vsel %vm68_vm0, %v86_v14, 0.0 }
  0x8b   :  { %89 = vadd.xlane.f32.xlu1 %v88_v15  ;;  %v74_v16 = vpop.xlane.xlu0 %73 }
  0x8c   :  { %v83_v17 = vmul.f32 %v81_v10, %v74_v16 }
  0x8e   :  { %v85_v18 = vsub.f32 %v67_v2, %v83_v17 }
  0x90   :  { %v87_v19 = vmul.f32 %v85_v18, %v85_v18 }
  0x92   :  { %v91_v20 = vsel %vm68_vm0, %v87_v19, 0.0 }
  0x93   :  { %92 = vadd.xlane.f32.xlu1 %v91_v20 }
  0xfe   :  { %v90_v25 = vpop.xlane.xlu1 %89 }
  0xff   :  { %v94_v26 = vmul.f32 %v90_v25, %v81_v10 }
 0x101   :  { %v96_v27 = vadd.f32 1e-05, %v94_v26 }
 0x103   :  { %209 = vrsqrt.f32 %v96_v27  ;;  %vm104_vm3 = vweird.f32 %v96_v27 }
 0x106   :  { %v93_v28 = vpop.xlane.xlu1 %92 }
 0x107   :  { %v95_v29 = vmul.f32 %v93_v28, %v81_v10 }
 0x109   :  { %v210_v30 = vpop.eup %209  ;;  %v97_v31 = vadd.f32 1e-05, %v95_v29 }
 0x10a   :  { %v99_v32 = vmul.f32 %v210_v30, %v96_v27  ;;  %vm105_vm2 = vweird.f32 %v210_v30 }
 0x10b   :  { %211 = vrsqrt.f32 %v97_v31  ;;  %vm106_vm4 = vmor %vm104_vm3, %vm105_vm2  ;;  %vm114_vm6 = vweird.f32 %v97_v31 }
 0x10c   :  { %v100_v33 = vmul.f32 %v210_v30, %v99_v32 }
 0x10e   :  { %v101_v34 = vmul.f32 0.5, %v100_v33 }
 0x110   :  { %v102_v35 = vsub.f32 1.5, %v101_v34 }
 0x111   :  { %v212_v36 = vpop.eup %211 }
 0x112   :  { %v103_v37 = vmul.f32 %v210_v30, %v102_v35  ;;  %v109_v38 = vmul.f32 %v212_v36, %v97_v31  ;;  %vm115_vm5 = vweird.f32 %v212_v36 }
 0x113   :  { %vm116_vm7 = vmor %vm114_vm6, %vm115_vm5 }
 0x114   :  { %v107_v40 = vsel %vm106_vm4, %v210_v30, %v103_v37  ;;  %v110_v41 = vmul.f32 %v212_v36, %v109_v38 }
 0x115   :  { %v118_v42 = vmul.f32 %v107_v40, %v84_v13 }
 0x116   :  { %v111_v44 = vmul.f32 0.5, %v110_v41 }
 0x117   :  { %v124_v45 = vmul.f32 %v204_v39, %v118_v42 }
 0x118   :  { %v112_v46 = vsub.f32 1.5, %v111_v44 }
 0x119   :  { %v130_v47 = vadd.f32 %v205_v43, %v124_v45 }
 0x11a   :  { %v113_v48 = vmul.f32 %v212_v36, %v112_v46 }
 0x11b   :  { %191 = vmatmul.msk.f32.vlgmr.msra.gmra.mxu0 %vm68_vm0, %v130_v47 }
 0x11c   :  { %v117_v49 = vsel %vm116_vm7, %v212_v36, %v113_v48 }
 0x11d   :  { %v119_v50 = vmul.f32 %v117_v49, %v85_v18 }
 0x11f   :  { %v125_v51 = vmul.f32 %v204_v39, %v119_v50 }
 0x121   :  { %v131_v52 = vadd.f32 %v205_v43, %v125_v51 }
 0x123   :  { %192 = vmatmul.msk.f32.vlgmr.msra.gmra.mxu1 %vm68_vm0, %v131_v52 }
 0x198   :  { %v163_v54 = vpop.f32.mrf.mxu0 }
 0x199   :  { %v164_v55 = vadd.f32 %v206_v53, %v163_v54 }
 0x19b   :  { %169 = vst [vmem:[#allocation8] sm:$0xff] %v164_v55 }
 0x1a0   :  { %v166_v56 = vpop.f32.mrf.mxu1 }
 0x1a1   :  { %v167_v57 = vadd.f32 %v206_v53, %v166_v56 }
 0x1a3   :  { %170 = vst [vmem:[#allocation8 + $0x8] sm:$0xff] %v167_v57 }
 0x1a4   :  { %183 = dma.vmem_to_hbm [thread:$0]  %s176_s11, 256, %s178_s14, [#allocation4], %s317_s28, %s317_s28, %s318_s29  }
 0x1a5   :  { %313 = dma.done.wait [#allocation4], 256  }
 0x1a6   :  { %314 = vsyncadd [#allocation4], 4294967040 }
 0x1a7   :  { %188 = vsyncpa [#allocation3], 1 }
 0x1a8   :  { %189 = vsyncpa [#allocation6], 1 }
 0x1a9   :  { %190 = vsyncpa [#allocation4], 1 }

</bundles_post_ra>
